<compile_context>
chip_gen: v6e
topology: v6e:2x2x1
jax: 0.10.0
libtpu: 0.0.40
codegen_flags: <defaults>
</compile_context>

<pallas_src>
import functools

import jax
import jax.numpy as jnp
from jax.experimental import pallas as pl
from jax.experimental.pallas import tpu as pltpu

D_MODEL = 768          # matches nn.Linear(768, 1) in the module
N_HEADS = 12
D_HEAD = D_MODEL // N_HEADS
D_FFN = 3072
TILE_F = 768           # FFN reduction tile (4 grid steps, ~2.25 MiB wt/step)
N_LAYERS = 2           # synthetic reduced-depth backbone (DistilBERT has 6)
VOCAB = 1000
MAX_POS = 64
LN_EPS = 1e-12
NEG_INF = -1e9

assert D_FFN % TILE_F == 0


def _gelu(x):
    # TODO(synk): HF DistilBERT uses exact erf GELU; erf has no guaranteed
    # Mosaic lowering, so the tanh approximation is used (tiny numeric diff).
    return 0.5 * x * (1.0 + jnp.tanh(
        0.7978845608028654 * (x + 0.044715 * x * x * x)))


def _layernorm_f32(x, g, b):
    mu = jnp.mean(x, axis=-1, keepdims=True)
    xc = x - mu
    var = jnp.mean(xc * xc, axis=-1, keepdims=True)
    return xc * jax.lax.rsqrt(var + LN_EPS) * g + b


# ----------------------------------------------------------------------------
# Pallas kernels
# ----------------------------------------------------------------------------
def _layer_kernel(x_ref, bias_ref,
                  wqkv_ref, bqkv_ref, wo_ref, bo_ref, ln1g_ref, ln1b_ref,
                  w1_ref, b1_ref, w2_ref, b2_ref, ln2g_ref, ln2b_ref,
                  o_ref, hmid_ref, acc_ref, *, batch, seq, scale):
    """One full encoder layer; grid axis = FFN-3072 reduction tiles."""
    step = pl.program_id(0)

    # ---- step 0: QKV, attention, o-proj + residual + LN1 -------------------
    @pl.when(step == 0)
    def _():
        x = x_ref[...]                                           # (M, D) bf16
        qkv = jnp.dot(x, wqkv_ref[...],
                      preferred_element_type=jnp.float32) + bqkv_ref[...]
        ctx_rows = []
        for b in range(batch):
            r0 = b * seq
            qkv_b = qkv[r0:r0 + seq, :]                          # (S, 3D) f32
            bias_b = bias_ref[b]                                 # (1, S) f32
            heads = []
            for h in range(N_HEADS):                             # lane slices
                q = qkv_b[:, h * D_HEAD:(h + 1) * D_HEAD]
                kk = qkv_b[:, D_MODEL + h * D_HEAD:
                           D_MODEL + (h + 1) * D_HEAD]
                v = qkv_b[:, 2 * D_MODEL + h * D_HEAD:
                          2 * D_MODEL + (h + 1) * D_HEAD]
                s = jax.lax.dot_general(
                    q.astype(jnp.bfloat16), kk.astype(jnp.bfloat16),
                    (((1,), (1,)), ((), ())),
                    preferred_element_type=jnp.float32) * scale
                s = s + bias_b                                   # key mask
                m = jnp.max(s, axis=-1, keepdims=True)
                p = jnp.exp(s - m)
                p = p * pl.reciprocal(jnp.sum(p, axis=-1, keepdims=True),
                                      approx=True)
                heads.append(jnp.dot(p.astype(jnp.bfloat16),
                                     v.astype(jnp.bfloat16),
                                     preferred_element_type=jnp.float32))
            ctx_rows.append(jnp.concatenate(heads, axis=-1))     # (S, D)
        ctx = jnp.concatenate(ctx_rows, axis=0)                  # (M, D) f32

        sa = jnp.dot(ctx.astype(jnp.bfloat16), wo_ref[...],
                     preferred_element_type=jnp.float32)
        sa = sa + bo_ref[...] + x.astype(jnp.float32)            # residual
        hmid_ref[...] = _layernorm_f32(sa, ln1g_ref[...], ln1b_ref[...])
        acc_ref[...] = jnp.zeros_like(acc_ref)

    # ---- every step: one 768-wide slice of the FFN ------------------------
    hmid_bf = hmid_ref[...].astype(jnp.bfloat16)
    up = jnp.dot(hmid_bf, w1_ref[...],
                 preferred_element_type=jnp.float32) + b1_ref[...]
    up = _gelu(up)
    acc_ref[...] += jnp.dot(up.astype(jnp.bfloat16), w2_ref[...],
                            preferred_element_type=jnp.float32)

    # ---- last step: bias + residual + LN2, bf16 store ----------------------
    @pl.when(step == pl.num_programs(0) - 1)
    def _():
        y = acc_ref[...] + b2_ref[...] + hmid_ref[...]
        o_ref[...] = _layernorm_f32(y, ln2g_ref[...],
                                    ln2b_ref[...]).astype(o_ref.dtype)


def encoder_layer(x, bias, lyr, *, batch, seq):
    """x: (B*S, 768) bf16, bias: (B, 1, S) f32 -> (B*S, 768) bf16."""
    M = batch * seq
    n_f = D_FFN // TILE_F
    scale = 1.0 / (D_HEAD ** 0.5)

    def c2(shape):                       # constant-index (resident) 2-D block
        return pl.BlockSpec(shape, lambda k: (0, 0))

    return pl.pallas_call(
        functools.partial(_layer_kernel, batch=batch, seq=seq, scale=scale),
        out_shape=jax.ShapeDtypeStruct((M, D_MODEL), jnp.bfloat16),
        grid=(n_f,),
        in_specs=[
            c2((M, D_MODEL)),                                     # x
            pl.BlockSpec((batch, 1, seq), lambda k: (0, 0, 0)),   # attn bias
            c2((D_MODEL, 3 * D_MODEL)),                           # w_qkv
            c2((1, 3 * D_MODEL)),                                 # b_qkv
            c2((D_MODEL, D_MODEL)),                               # wo
            c2((1, D_MODEL)),                                     # bo
            c2((1, D_MODEL)),                                     # ln1_g
            c2((1, D_MODEL)),                                     # ln1_b
            pl.BlockSpec((D_MODEL, TILE_F), lambda k: (0, k)),    # w1 tile
            pl.BlockSpec((1, TILE_F), lambda k: (0, k)),          # b1 tile
            pl.BlockSpec((TILE_F, D_MODEL), lambda k: (k, 0)),    # w2 tile
            c2((1, D_MODEL)),                                     # b2
            c2((1, D_MODEL)),                                     # ln2_g
            c2((1, D_MODEL)),                                     # ln2_b
        ],
        out_specs=c2((M, D_MODEL)),
        scratch_shapes=[pltpu.VMEM((M, D_MODEL), jnp.float32),    # post-LN1
                        pltpu.VMEM((M, D_MODEL), jnp.float32)],   # FFN acc
        compiler_params=pltpu.CompilerParams(
            dimension_semantics=("arbitrary",),
            vmem_limit_bytes=32 * 1024 * 1024),
    )(x, bias,
      lyr["w_qkv"], lyr["b_qkv"].reshape(1, -1),
      lyr["wo"], lyr["bo"].reshape(1, -1),
      lyr["ln1_g"].reshape(1, -1), lyr["ln1_b"].reshape(1, -1),
      lyr["w1"], lyr["b1"].reshape(1, -1),
      lyr["w2"], lyr["b2"].reshape(1, -1),
      lyr["ln2_g"].reshape(1, -1), lyr["ln2_b"].reshape(1, -1))


def _ln_kernel(x_ref, g_ref, b_ref, o_ref):
    o_ref[...] = _layernorm_f32(x_ref[...], g_ref[...],
                                b_ref[...]).astype(o_ref.dtype)


def embed_layernorm(x, g, b):
    """Embedding LayerNorm: (M, 768) f32 -> (M, 768) bf16."""
    M, D = x.shape
    return pl.pallas_call(
        _ln_kernel,
        out_shape=jax.ShapeDtypeStruct((M, D), jnp.bfloat16),
        grid=(1,),
        in_specs=[pl.BlockSpec((M, D), lambda i: (0, 0)),
                  pl.BlockSpec((1, D), lambda i: (0, 0)),
                  pl.BlockSpec((1, D), lambda i: (0, 0))],
        out_specs=pl.BlockSpec((M, D), lambda i: (0, 0)),
    )(x, g.reshape(1, D), b.reshape(1, D))


def _head_kernel(x_ref, w_ref, b_ref, o_ref):
    # VPU lane reduction instead of a degenerate (B,768)@(768,1) MXU matmul.
    x = x_ref[...].astype(jnp.float32)                    # (B, D)
    z = jnp.sum(x * w_ref[...], axis=-1, keepdims=True) + b_ref[...]
    o_ref[...] = 1.0 / (1.0 + jnp.exp(-z))


def cls_head(x, w, b):
    """sigmoid(x @ w + b): (B, 768) bf16 -> (B, 1) f32."""
    B, D = x.shape
    return pl.pallas_call(
        _head_kernel,
        out_shape=jax.ShapeDtypeStruct((B, 1), jnp.float32),
        grid=(1,),
        in_specs=[pl.BlockSpec((B, D), lambda i: (0, 0)),
                  pl.BlockSpec((1, D), lambda i: (0, 0)),
                  pl.BlockSpec((1, 1), lambda i: (0, 0))],
        out_specs=pl.BlockSpec((B, 1), lambda i: (0, 0)),
    )(x, w.reshape(1, D), b.reshape(1, 1))


# ----------------------------------------------------------------------------
# Parameters (deterministic synthetic init) and forward pass (glue in JAX)
# ----------------------------------------------------------------------------
def init_params(key):
    keys = iter(jax.random.split(key, 4 + 4 * N_LAYERS))

    def w(shape, scale=0.02, dtype=jnp.bfloat16):
        return (jax.random.normal(next(keys), shape, jnp.float32)
                * scale).astype(dtype)

    def zeros(n):
        return jnp.zeros((n,), jnp.float32)

    def ones(n):
        return jnp.ones((n,), jnp.float32)

    layers = []
    for _ in range(N_LAYERS):
        layers.append({
            # fused Q|K|V projection weight (768, 2304) in bf16
            "w_qkv": w((D_MODEL, 3 * D_MODEL)), "b_qkv": zeros(3 * D_MODEL),
            "wo": w((D_MODEL, D_MODEL)), "bo": zeros(D_MODEL),
            "ln1_g": ones(D_MODEL), "ln1_b": zeros(D_MODEL),
            "w1": w((D_MODEL, D_FFN)), "b1": zeros(D_FFN),
            "w2": w((D_FFN, D_MODEL)), "b2": zeros(D_MODEL),
            "ln2_g": ones(D_MODEL), "ln2_b": zeros(D_MODEL),
        })
    return {
        "word_emb": w((VOCAB, D_MODEL), dtype=jnp.float32),
        "pos_emb": w((MAX_POS, D_MODEL), dtype=jnp.float32),
        "emb_ln_g": ones(D_MODEL), "emb_ln_b": zeros(D_MODEL),
        "layers": layers,
        "head_w": w((D_MODEL, 1), dtype=jnp.float32),
        "head_b": zeros(1),
    }


def sentiment_transformer_forward(params, input_ids, attention_mask):
    B, S = input_ids.shape
    assert S <= MAX_POS, "sequence length exceeds positional embedding table"

    # Embeddings (gather is glue); embedding LayerNorm in Pallas -> bf16.
    h = jnp.take(params["word_emb"], input_ids, axis=0)          # (B, S, D)
    h = h + params["pos_emb"][:S][None, :, :]
    h2 = embed_layernorm(h.reshape(B * S, D_MODEL),
                         params["emb_ln_g"], params["emb_ln_b"])
    # TODO(synk): dropout layers are identity here (eval-mode semantics).

    # Additive attention bias from the (B, S) 0/1 mask -> (B, 1, S).
    bias = jnp.where(attention_mask > 0, 0.0, NEG_INF).astype(jnp.float32)
    bias = bias.reshape(B, 1, S)

    # One fused pallas_call per encoder layer (QKV -> attention ->
    # o-proj+LN1 -> FFN1+GELU -> FFN2+LN2), FFN dim as in-kernel reduction.
    for lyr in params["layers"]:
        h2 = encoder_layer(h2, bias, lyr, batch=B, seq=S)

    pooled = h2.reshape(B, S, D_MODEL)[:, 0, :]   # outputs[0][:, 0, :] (CLS)
    # dropout -> identity; Linear(768, 1) + sigmoid fused in one Pallas kernel.
    return cls_head(pooled, params["head_w"], params["head_b"])


if __name__ == "__main__":
    key = jax.random.PRNGKey(0)
    pkey, ikey = jax.random.split(key)
    params = init_params(pkey)

    B, S = 2, 8
    input_ids = jax.random.randint(ikey, (B, S), 0, VOCAB, dtype=jnp.int32)
    attention_mask = jnp.ones((B, S), jnp.int32).at[1, 6:].set(0)

    out = sentiment_transformer_forward(params, input_ids, attention_mask)
    out = jax.block_until_ready(out)
    assert out.shape == (B, 1) and out.dtype == jnp.float32
    assert bool(jnp.all((out >= 0.0) & (out <= 1.0)))
    print("KERNEL_OK")
</pallas_src>

<mosaic_0001>
module attributes {stable_mosaic.version = 11 : i64} {
  func.func @_ln_kernel(%arg0: i32, %arg1: memref<16x768xf32, #tpu.memory_space<vmem>>, %arg2: memref<1x768xf32, #tpu.memory_space<vmem>>, %arg3: memref<1x768xf32, #tpu.memory_space<vmem>>, %arg4: memref<16x768xbf16, #tpu.memory_space<vmem>>) attributes {dimension_semantics = [#tpu.dimension_semantics<arbitrary>], iteration_bounds = array<i64: 1>, scalar_prefetch = 0 : i64, scratch_operands = 0 : i64, tpu.core_type = #tpu.core_type<tc>, window_params = [{pipeline_mode = #tpu.pipeline_mode<synchronous>, transform_indices = @transform_0, window_bounds = array<i64: 16, 768>}, {pipeline_mode = #tpu.pipeline_mode<synchronous>, transform_indices = @transform_1, window_bounds = array<i64: 1, 768>}, {pipeline_mode = #tpu.pipeline_mode<synchronous>, transform_indices = @transform_2, window_bounds = array<i64: 1, 768>}, {pipeline_mode = #tpu.pipeline_mode<synchronous>, transform_indices = @transform_3, window_bounds = array<i64: 16, 768>}]} {
    %c0 = arith.constant 0 : index
    %c0_0 = arith.constant 0 : index
    %0 = vector.load %arg1[%c0, %c0_0] : memref<16x768xf32, #tpu.memory_space<vmem>>, vector<16x768xf32>
    %c0_1 = arith.constant 0 : index
    %c0_2 = arith.constant 0 : index
    %1 = vector.load %arg2[%c0_1, %c0_2] : memref<1x768xf32, #tpu.memory_space<vmem>>, vector<1x768xf32>
    %c0_3 = arith.constant 0 : index
    %c0_4 = arith.constant 0 : index
    %2 = vector.load %arg3[%c0_3, %c0_4] : memref<1x768xf32, #tpu.memory_space<vmem>>, vector<1x768xf32>
    %cst = arith.constant dense<0.000000e+00> : vector<16xf32>
    %3 = vector.multi_reduction <add>, %0, %cst [1] : vector<16x768xf32> to vector<16xf32>
    %4 = vector.shape_cast %3 : vector<16xf32> to vector<16x1xf32>
    %cst_5 = arith.constant 7.680000e+02 : f32
    %5 = vector.broadcast %cst_5 : f32 to vector<16x1xf32>
    %6 = arith.divf %4, %5 : vector<16x1xf32>
    %7 = vector.broadcast %6 : vector<16x1xf32> to vector<16x768xf32>
    %8 = arith.subf %0, %7 : vector<16x768xf32>
    %9 = arith.mulf %8, %8 : vector<16x768xf32>
    %cst_6 = arith.constant dense<0.000000e+00> : vector<16xf32>
    %10 = vector.multi_reduction <add>, %9, %cst_6 [1] : vector<16x768xf32> to vector<16xf32>
    %11 = vector.shape_cast %10 : vector<16xf32> to vector<16x1xf32>
    %cst_7 = arith.constant 7.680000e+02 : f32
    %12 = vector.broadcast %cst_7 : f32 to vector<16x1xf32>
    %13 = arith.divf %11, %12 : vector<16x1xf32>
    %cst_8 = arith.constant 9.99999996E-13 : f32
    %14 = vector.broadcast %cst_8 : f32 to vector<16x1xf32>
    %15 = arith.addf %13, %14 : vector<16x1xf32>
    %16 = math.rsqrt %15 : vector<16x1xf32>
    %17 = vector.broadcast %16 : vector<16x1xf32> to vector<16x768xf32>
    %18 = arith.mulf %8, %17 : vector<16x768xf32>
    %19 = vector.broadcast %1 : vector<1x768xf32> to vector<16x768xf32>
    %20 = arith.mulf %18, %19 : vector<16x768xf32>
    %21 = vector.broadcast %2 : vector<1x768xf32> to vector<16x768xf32>
    %22 = arith.addf %20, %21 : vector<16x768xf32>
    %23 = arith.truncf %22 : vector<16x768xf32> to vector<16x768xbf16>
    %c0_9 = arith.constant 0 : index
    %c0_10 = arith.constant 0 : index
    %24 = vector.load %arg4[%c0_9, %c0_10] : memref<16x768xbf16, #tpu.memory_space<vmem>>, vector<16x768xbf16>
    tpu.vector_store %arg4[%c0_9, %c0_10], %23 {strides = array<i32>} : memref<16x768xbf16, #tpu.memory_space<vmem>>, vector<16x768xbf16>,
    return
  }
  func.func @transform_0(%arg0: i32) -> (i32, i32) {
    %c0_i32 = arith.constant 0 : i32
    %c0_i32_0 = arith.constant 0 : i32
    %c0_i32_1 = arith.constant 0 : i32
    return %c0_i32, %c0_i32_0 : i32, i32
  }
  func.func @transform_1(%arg0: i32) -> (i32, i32) {
    %c0_i32 = arith.constant 0 : i32
    %c0_i32_0 = arith.constant 0 : i32
    %c0_i32_1 = arith.constant 0 : i32
    return %c0_i32, %c0_i32_0 : i32, i32
  }
  func.func @transform_2(%arg0: i32) -> (i32, i32) {
    %c0_i32 = arith.constant 0 : i32
    %c0_i32_0 = arith.constant 0 : i32
    %c0_i32_1 = arith.constant 0 : i32
    return %c0_i32, %c0_i32_0 : i32, i32
  }
  func.func @transform_3(%arg0: i32) -> (i32, i32) {
    %c0_i32 = arith.constant 0 : i32
    %c0_i32_0 = arith.constant 0 : i32
    %c0_i32_1 = arith.constant 0 : i32
    return %c0_i32, %c0_i32_0 : i32, i32
  }
}

</mosaic_0001>

<bundles_post_ra>
// kernel: tpu_custom_call.1
= control target key start
LH: loop header
LB: loop body
LE: loop exit
PB: predicated region body
PF: predicated region fallthrough
CT: control target
= control target key end

     0   :  { %8 = vsyncpa [#allocation3], 0  ;;  %s480_s0 = inlined_call_operand.hbm [shape: f32[16,768], index: 0, kind: input, shape index: {}]   ;;  %s481_s1 = inlined_call_operand.hbm [shape: f32[1,768], index: 1, kind: input, shape index: {}]   ;;  %s482_s2 = inlined_call_operand.hbm [shape: f32[1,768], index: 2, kind: input, shape index: {}]   ;;  %s483_s3 = inlined_call_operand.hbm [shape: bf16[16,768], index: 3, kind: output, shape index: {}]  }
   0x1   :  { %9 = vsyncpa [#allocation6], 0 }
   0x2   :  { %10 = vsyncpa [#allocation4], 0  ;;  %s395_s12 = smov [#allocation5]   ;;  %s396_s14 = smov [#allocation2]  }
   0x3   :  { %s29_s13 = sshll.u32 %s395_s12, 4  ;;  %s16_s15 = sshll.u32 %s396_s14, 4  ;;  %s30_s13 = int_to_ptr.vmem [resolvable:$true] %s29_s13  ;;  %s17_s15 = int_to_ptr.vmem [resolvable:$true] %s16_s15 }
   0x4   :  { %s317_s16 = scalar_lea.vmem %s30_s13, 96  ;;  %p322_p1 = scmp.lt.s32.totalorder %s30_s13, %s30_s13 }
   0x5   :  { %p318_p0 = scmp.ne.s32.totalorder %s30_s13, %s317_s16  ;;  %p323_p2 = scmp.lt.s32.totalorder %s317_s16, %s317_s16 }
   0x7   :  { %p324_p3 = por %p323_p2, %p322_p1 }
   0x9   :  { %p325_p4 = pnand %p324_p3, %p318_p0 }
   0xb   :  { %328 = shalt.err (!%p325_p4)
}
   0xc   :  { %32 = dma.hbm_to_vmem [thread:$0]  %s481_s1, 96, %s30_s13, [#allocation6]  }
   0xd   :  { %s337_s19 = scalar_lea.vmem %s17_s15, 1536  ;;  %p342_p6 = scmp.lt.s32.totalorder %s17_s15, %s17_s15 }
   0xe   :  { %p338_p5 = scmp.ne.s32.totalorder %s17_s15, %s337_s19  ;;  %p343_p7 = scmp.lt.s32.totalorder %s337_s19, %s337_s19 }
  0x10   :  { %p344_p8 = por %p343_p7, %p342_p6 }
  0x12   :  { %p345_p9 = pnand %p344_p8, %p338_p5 }
  0x14   :  { %348 = shalt.err (!%p345_p9)
}
  0x15   :  { %s397_s20 = smov 768   ;;  %s398_s21 = smov 48  }
  0x16   :  { %22 = dma.hbm_to_vmem [thread:$0]  %s480_s0, 1536, %s17_s15, [#allocation3], %s397_s20, %s397_s20, %s398_s21  }
  0x17   :  { %s399_s24 = smov [#allocation7]  }
  0x18   :  { %s39_s25 = sshll.u32 %s399_s24, 4  ;;  %s40_s25 = int_to_ptr.vmem [resolvable:$true] %s39_s25 }
  0x19   :  { %s357_s26 = scalar_lea.vmem %s40_s25, 96  ;;  %p362_p11 = scmp.lt.s32.totalorder %s40_s25, %s40_s25 }
  0x1a   :  { %p358_p10 = scmp.ne.s32.totalorder %s40_s25, %s357_s26  ;;  %p363_p12 = scmp.lt.s32.totalorder %s357_s26, %s357_s26 }
  0x1c   :  { %p364_p13 = por %p363_p12, %p362_p11 }
  0x1e   :  { %p365_p0 = pnand %p364_p13, %p358_p10 }
  0x20   :  { %368 = shalt.err (!%p365_p0)
}
  0x21   :  { %42 = dma.hbm_to_vmem [thread:$0]  %s482_s2, 96, %s40_s25, [#allocation6]  }
  0x22   :  { %389 = dma.done.wait [#allocation3], 1536  }
  0x23   :  { %390 = vsyncadd [#allocation3], 4294965760 }
  0x24   :  { %391 = dma.done.wait [#allocation6], 192  }
  0x25   :  { %392 = vsyncadd [#allocation6], 4294967104  ;;  %v52_v0 = vld [vmem:[#allocation2] sm:$0xff]  ;;  %v53_v1 = vld [vmem:[#allocation2 + $0x8] sm:$0xff]  ;;  %s400_s0 = smov [#allocation8]  }
  0x26   :  { %v54_v2 = vld [vmem:[#allocation2 + $0x10] sm:$0xff]  ;;  %v55_v3 = vld [vmem:[#allocation2 + $0x18] sm:$0xff]  ;;  %v66_v4 = vadd.f32 %v53_v1, %v52_v0  ;;  %v60_v7 = vld [vmem:[#allocation2 + $0x40] sm:$0xff]  ;;  %s272_s2 = sshll.u32 %s400_s0, 4  ;;  %s273_s2 = int_to_ptr.vmem [resolvable:$true] %s272_s2 }
  0x27   :  { %v58_v5 = vld [vmem:[#allocation2 + $0x30] sm:$0xff]  ;;  %v59_v6 = vld [vmem:[#allocation2 + $0x38] sm:$0xff]  ;;  %v56_v10 = vld [vmem:[#allocation2 + $0x20] sm:$0xff]  ;;  %s369_s28 = scalar_lea.vmem %s273_s2, 768  ;;  %p374_p2 = scmp.lt.s32.totalorder %s273_s2, %s273_s2 }
  0x28   :  { %v67_v8 = vadd.f32 %v66_v4, %v54_v2  ;;  %v73_v9 = vadd.f32 %v59_v6, %v58_v5  ;;  %v61_v11 = vld [vmem:[#allocation2 + $0x48] sm:$0xff]  ;;  %v62_v15 = vld [vmem:[#allocation2 + $0x50] sm:$0xff]  ;;  %v63_v18 = vld [vmem:[#allocation2 + $0x58] sm:$0xff]  ;;  %p370_p1 = scmp.ne.s32.totalorder %s273_s2, %s369_s28  ;;  %p375_p3 = scmp.lt.s32.totalorder %s369_s28, %s369_s28 }
  0x29   :  { %v57_v14 = vld [vmem:[#allocation2 + $0x28] sm:$0xff] }
  0x2a   :  { %v68_v12 = vadd.f32 %v67_v8, %v55_v3  ;;  %v74_v13 = vadd.f32 %v73_v9, %v60_v7  ;;  %v64_v8 = vld [vmem:[#allocation5] sm:$0x3f]  ;;  %p376_p4 = por %p375_p3, %p374_p2 }
  0x2c   :  { %v69_v16 = vadd.f32 %v68_v12, %v56_v10  ;;  %v75_v17 = vadd.f32 %v74_v13, %v61_v11  ;;  %p377_p5 = pnand %p376_p4, %p370_p1 }
  0x2e   :  { %v70_v19 = vadd.f32 %v69_v16, %v57_v14  ;;  %v76_v20 = vadd.f32 %v75_v17, %v62_v15 }
  0x30   :  { %71 = vadd.xlane.f32.xlu0 %v70_v19  ;;  %v77_v21 = vadd.f32 %v76_v20, %v63_v18 }
  0x34   :  { %78 = vadd.xlane.f32.xlu0 %v77_v21 }
  0xb9   :  { %v72_v22 = vpop.xlane.xlu0 %71 }
  0xba   :  { %v81_v23 = vmul.f32 0.0013020834, %v72_v22 }
  0xbc   :  { %v432_v24 = vsub.f32 %v52_v0, %v81_v23  ;;  %v434_v25 = vsub.f32 %v53_v1, %v81_v23  ;;  %v436_v26 = vsub.f32 %v54_v2, %v81_v23  ;;  %v438_v28 = vsub.f32 %v55_v3, %v81_v23 }
  0xbd   :  { %v79_v27 = vpop.xlane.xlu0 %78  ;;  %v87_v32 = vsub.f32 %v56_v10, %v81_v23  ;;  %v88_v38 = vsub.f32 %v57_v14, %v81_v23  ;;  %v140_v1 = vlaneseq }
  0xbe   :  { %v82_v29 = vmul.f32 0.0013020834, %v79_v27  ;;  %v95_v30 = vmul.f32 %v432_v24, %v432_v24  ;;  %v96_v31 = vmul.f32 %v434_v25, %v434_v25  ;;  %v97_v33 = vmul.f32 %v436_v26, %v436_v26 }
  0xbf   :  { %v98_v39 = vmul.f32 %v438_v28, %v438_v28  ;;  %v99_v44 = vmul.f32 %v87_v32, %v87_v32  ;;  %v100_v49 = vmul.f32 %v88_v38, %v88_v38  ;;  %v141_v3 = vshrl.u32 %v140_v1, 7 }
  0xc0   :  { %v107_v34 = vadd.f32 %v96_v31, %v95_v30  ;;  %v446_v35 = vsub.f32 %v58_v5, %v82_v29  ;;  %v448_v36 = vsub.f32 %v59_v6, %v82_v29  ;;  %v450_v37 = vsub.f32 %v60_v7, %v82_v29 }
  0xc1   :  { %v454_v41 = vsub.f32 %v61_v11, %v82_v29  ;;  %v460_v46 = vsub.f32 %v62_v15, %v82_v29  ;;  %v94_v51 = vsub.f32 %v63_v18, %v82_v29  ;;  %v142_v4 = vsub.s32 0, %v141_v3  ;;  %v65_v11 = vld [vmem:[#allocation7] sm:$0x3f] }
  0xc2   :  { %v108_v40 = vadd.f32 %v107_v34, %v97_v33  ;;  %v101_v42 = vmul.f32 %v446_v35, %v446_v35  ;;  %v102_v43 = vmul.f32 %v448_v36, %v448_v36  ;;  %v103_v47 = vmul.f32 %v450_v37, %v450_v37 }
  0xc3   :  { %v104_v52 = vmul.f32 %v454_v41, %v454_v41  ;;  %v105_v55 = vmul.f32 %v460_v46, %v460_v46  ;;  %v106_v57 = vmul.f32 %v94_v51, %v94_v51  ;;  %v146_v5 = vsub.s32 1, %v141_v3 }
  0xc4   :  { %v109_v45 = vadd.f32 %v108_v40, %v98_v39  ;;  %v114_v48 = vadd.f32 %v102_v43, %v101_v42  ;;  %v150_v6 = vsub.s32 2, %v141_v3  ;;  %v154_v7 = vsub.s32 3, %v141_v3 }
  0xc5   :  { %v158_v9 = vsub.s32 4, %v141_v3  ;;  %v162_v10 = vsub.s32 5, %v141_v3  ;;  %v143_v12 = vrot.slane %v64_v8, %v142_v4  ;;  %v147_v13 = vrot.slane %v64_v8, %v146_v5 }
  0xc6   :  { %v110_v50 = vadd.f32 %v109_v45, %v99_v44  ;;  %v115_v53 = vadd.f32 %v114_v48, %v103_v47  ;;  %v151_v14 = vrot.slane %v64_v8, %v150_v6  ;;  %v155_v15 = vrot.slane %v64_v8, %v154_v7 }
  0xc7   :  { %v159_v17 = vrot.slane %v64_v8, %v158_v9  ;;  %v163_v18 = vrot.slane %v64_v8, %v162_v10  ;;  %v186_v19 = vrot.slane %v65_v11, %v142_v4  ;;  %v190_v20 = vrot.slane %v65_v11, %v146_v5 }
  0xc8   :  { %v111_v54 = vadd.f32 %v110_v50, %v100_v49  ;;  %v116_v56 = vadd.f32 %v115_v53, %v104_v52  ;;  %v194_v31 = vrot.slane %v65_v11, %v150_v6  ;;  %v198_v33 = vrot.slane %v65_v11, %v154_v7 }
  0xc9   :  { %v202_v40 = vrot.slane %v65_v11, %v158_v9  ;;  %v206_v42 = vrot.slane %v65_v11, %v162_v10 }
  0xca   :  { %112 = vadd.xlane.f32.xlu1 %v111_v54  ;;  %v117_v58 = vadd.f32 %v116_v56, %v105_v55 }
  0xcc   :  { %v118_v59 = vadd.f32 %v117_v58, %v106_v57 }
  0xce   :  { %119 = vadd.xlane.f32.xlu1 %v118_v59 }
 0x153   :  { %v113_v60 = vpop.xlane.xlu1 %112 }
 0x154   :  { %v121_v61 = vmul.f32 0.0013020834, %v113_v60 }
 0x156   :  { %v123_v62 = vadd.f32 1e-12, %v121_v61 }
 0x157   :  { %v120_v63 = vpop.xlane.xlu1 %119 }
 0x158   :  { %305 = vrsqrt.f32 %v123_v62  ;;  %v122_v0 = vmul.f32 0.0013020834, %v120_v63 }
 0x15a   :  { %v124_v2 = vadd.f32 1e-12, %v122_v0 }
 0x15c   :  { %307 = vrsqrt.f32 %v124_v2 }
 0x165   :  { %v306_v16 = vpop.eup %305 }
 0x166   :  { %v127_v21 = vmul.f32 %v306_v16, %v432_v24  ;;  %v128_v22 = vmul.f32 %v306_v16, %v434_v25  ;;  %v129_v23 = vmul.f32 %v306_v16, %v436_v26  ;;  %v130_v27 = vmul.f32 %v306_v16, %v438_v28 }
 0x167   :  { %v131_v29 = vmul.f32 %v306_v16, %v87_v32  ;;  %v132_v30 = vmul.f32 %v306_v16, %v88_v38 }
 0x168   :  { %v170_v34 = vmul.f32 %v143_v12, %v127_v21  ;;  %v171_v39 = vmul.f32 %v147_v13, %v128_v22  ;;  %v172_v44 = vmul.f32 %v151_v14, %v129_v23  ;;  %v173_v45 = vmul.f32 %v155_v15, %v130_v27 }
 0x169   :  { %v308_v43 = vpop.eup %307  ;;  %v174_v47 = vmul.f32 %v159_v17, %v131_v29  ;;  %v175_v48 = vmul.f32 %v163_v18, %v132_v30 }
 0x16a   :  { %v133_v24 = vmul.f32 %v308_v43, %v446_v35  ;;  %v134_v25 = vmul.f32 %v308_v43, %v448_v36  ;;  %v135_v26 = vmul.f32 %v308_v43, %v450_v37  ;;  %v136_v28 = vmul.f32 %v308_v43, %v454_v41 }
 0x16b   :  { %v137_v32 = vmul.f32 %v308_v43, %v460_v46  ;;  %v138_v38 = vmul.f32 %v308_v43, %v94_v51  ;;  %v213_v49 = vadd.f32 %v186_v19, %v170_v34  ;;  %v214_v50 = vadd.f32 %v190_v20, %v171_v39 }
 0x16c   :  { %v176_v52 = vmul.f32 %v143_v12, %v133_v24  ;;  %v177_v53 = vmul.f32 %v147_v13, %v134_v25  ;;  %v178_v54 = vmul.f32 %v151_v14, %v135_v26  ;;  %v179_v55 = vmul.f32 %v155_v15, %v136_v28 }
 0x16d   :  { %v180_v56 = vmul.f32 %v159_v17, %v137_v32  ;;  %v181_v57 = vmul.f32 %v163_v18, %v138_v38  ;;  %v215_v58 = vadd.f32 %v194_v31, %v172_v44  ;;  %v216_v59 = vadd.f32 %v198_v33, %v173_v45 }
 0x16e   :  { %v217_v35 = vadd.f32 %v202_v40, %v174_v47  ;;  %v218_v60 = vadd.f32 %v206_v42, %v175_v48  ;;  %v219_v36 = vadd.f32 %v186_v19, %v176_v52  ;;  %v220_v61 = vadd.f32 %v190_v20, %v177_v53 }
 0x16f   :  { %v221_v37 = vadd.f32 %v194_v31, %v178_v54  ;;  %v222_v41 = vadd.f32 %v198_v33, %v179_v55  ;;  %v223_v46 = vadd.f32 %v202_v40, %v180_v56  ;;  %v224_v51 = vadd.f32 %v206_v42, %v181_v57 }
 0x170   :  { %v291_v62 = vpack.c.bf16 %v214_v50, %v213_v49  ;;  %v292_v63 = vpack.c.bf16 %v216_v59, %v215_v58  ;;  %v293_v0 = vpack.c.bf16 %v218_v60, %v217_v35  ;;  %v294_v1 = vpack.c.bf16 %v220_v61, %v219_v36 }
 0x171   :  { %v295_v2 = vpack.c.bf16 %v222_v41, %v221_v37  ;;  %v296_v3 = vpack.c.bf16 %v224_v51, %v223_v46 }
 0x172   :  { %261 = vst [vmem:[#allocation8] sm:$0xff] %v291_v62  ;;  %262 = vst [vmem:[#allocation8 + $0x8] sm:$0xff] %v292_v63 }
 0x173   :  { %263 = vst [vmem:[#allocation8 + $0x10] sm:$0xff] %v293_v0  ;;  %264 = vst [vmem:[#allocation8 + $0x18] sm:$0xff] %v294_v1 }
 0x174   :  { %265 = vst [vmem:[#allocation8 + $0x20] sm:$0xff] %v295_v2  ;;  %266 = vst [vmem:[#allocation8 + $0x28] sm:$0xff] %v296_v3 }
 0x175   :  { %380 = shalt.err (!%p377_p5)
}
 0x176   :  { %s401_s29 = smov 384   ;;  %s402_s30 = smov 24  }
 0x177   :  { %278 = dma.vmem_to_hbm [thread:$0]  %s273_s2, 768, %s483_s3, [#allocation4], %s401_s29, %s401_s29, %s402_s30  }
 0x178   :  { %393 = dma.done.wait [#allocation4], 768  }
 0x179   :  { %394 = vsyncadd [#allocation4], 4294966528 }
 0x17a   :  { %282 = vsyncpa [#allocation3], 1 }
 0x17b   :  { %283 = vsyncpa [#allocation6], 1 }
 0x17c   :  { %284 = vsyncpa [#allocation4], 1 }

</bundles_post_ra>
